<compile_context>
chip_gen: v7x
topology: tpu7x:2x2x1
jax: 0.10.0
libtpu: 0.0.40
codegen_flags: <defaults>
</compile_context>

<pallas_src>
from functools import partial

import jax
import jax.numpy as jnp
from jax.experimental import pallas as pl
from jax.experimental.pallas import tpu as pltpu

_SUBLANE = 8  # f32 sublane: batch-tile rows kept a multiple of this


def _round_up(n, m):
    return ((n + m - 1) // m) * m


def _pick_batch_tile(batch, batch_tile):
    """Pick the batch tile (rows per grid step).

    * multiple of 8 sublanes (or == full batch when batch <= 8),
    * capped at `batch_tile` (default 1024: ~86% of HBM streaming roofline),
    * split so the grid has >= 2 steps when the batch allows it, so v7x's
      second TensorCore is used via dimension_semantics=("parallel",).
    """
    if batch <= _SUBLANE:
        return batch  # block dim == full array dim is always legal
    tm = min(_round_up(batch_tile, _SUBLANE), _round_up(batch, _SUBLANE))
    if pl.cdiv(batch, tm) < 2 and batch >= 2 * _SUBLANE:
        tm = _round_up(pl.cdiv(batch, 2), _SUBLANE)
    return tm


def _apply_act(y, act):
    if act is None:
        return y
    if act == "tanh":
        return jnp.tanh(y)   # f32 -> EUP slot (free) on all generations
    if act == "relu":
        return jnp.maximum(y, 0.0)
    return act(y)            # arbitrary jnp-compatible callable


def _make_mlp_kernel(num_layers, activation, output_activation, compute_dtype):
    """Fused MLP kernel body for `num_layers` Linear layers.

    Ref order: x_ref, w0, b0, w1, b1, ..., w_{L-1}, b_{L-1}, o_ref.
    Hidden activations are values in VMEM/vregs; only x and the final output
    are DMA'd.  Matmul operands are cast to `compute_dtype` (bf16 fast path on
    v6e/v7x); accumulation, bias-add and tanh stay in f32.
    """
    def kernel(*refs):
        x_ref = refs[0]
        o_ref = refs[1 + 2 * num_layers]
        h = x_ref[...].astype(jnp.float32)
        for l in range(num_layers):
            w = refs[1 + 2 * l][...]          # stored in compute_dtype
            b = refs[2 + 2 * l][...]          # f32
            y = jnp.dot(h.astype(compute_dtype), w,
                        preferred_element_type=jnp.float32)
            y = y + b.astype(jnp.float32)
            act = activation if l < num_layers - 1 else output_activation
            h = _apply_act(y, act)
        o_ref[...] = h.astype(o_ref.dtype)

    return kernel


def fused_mlp_forward(x, weights, biases, *, tm, activation, output_activation):
    """Single pallas_call for the whole MLP.

    x:       (B, D0) f32 (true, unpadded shapes everywhere)
    weights: tuple of (D_in, D_out) arrays (PyTorch W.T), possibly bf16
    biases:  tuple of (1, D_out) f32 arrays
    """
    B, in_dim = x.shape
    num_layers = len(weights)
    out_dim = weights[-1].shape[1]
    grid = (pl.cdiv(B, tm),)

    # x / out tiles move with the batch grid index; parameters map to the same
    # (full-array) block every step so they stay resident in VMEM.
    in_specs = [pl.BlockSpec((tm, in_dim), lambda i: (i, 0))]
    flat_params = []
    for w, b in zip(weights, biases):
        k_in, k_out = w.shape
        in_specs.append(pl.BlockSpec((k_in, k_out), lambda i: (0, 0)))
        in_specs.append(pl.BlockSpec((1, k_out), lambda i: (0, 0)))
        flat_params.extend((w, b))
    # TODO(synk): if hidden widths are ever scaled up, give the parameter
    # BlockSpecs pipeline_mode=pl.Buffered(1) (single-buffer) and set
    # vmem_limit_bytes in CompilerParams; irrelevant at these sizes.

    kernel = _make_mlp_kernel(num_layers, activation, output_activation,
                              weights[0].dtype)

    flops = 2 * B * sum(int(w.shape[0]) * int(w.shape[1]) for w in weights)
    transcendentals = B * sum(int(w.shape[1]) for w in weights[:-1])
    if output_activation == "tanh":
        transcendentals += B * out_dim
    bytes_accessed = (
        x.size * x.dtype.itemsize
        + B * out_dim * x.dtype.itemsize
        + sum(w.size * w.dtype.itemsize + b.size * b.dtype.itemsize
              for w, b in zip(weights, biases)))

    return pl.pallas_call(
        kernel,
        out_shape=jax.ShapeDtypeStruct((B, out_dim), x.dtype),
        grid=grid,
        in_specs=in_specs,
        out_specs=pl.BlockSpec((tm, out_dim), lambda i: (i, 0)),
        compiler_params=pltpu.CompilerParams(
            # batch tiles are independent -> shard across TCs on v7x
            dimension_semantics=("parallel",),
        ),
        cost_estimate=pl.CostEstimate(
            flops=flops,
            transcendentals=transcendentals,
            bytes_accessed=bytes_accessed),
    )(x, *flat_params)


@partial(jax.jit, static_argnames=("tm", "activation", "output_activation",
                                   "add_beta_bias", "output_squeeze",
                                   "squeeze_batch"))
def _mlp_forward(x, weights, biases, *, tm, activation, output_activation,
                 add_beta_bias, output_squeeze, squeeze_batch):
    # One jitted dispatch for the whole forward: pallas_call + epilogue.
    out = fused_mlp_forward(x, weights, biases, tm=tm,
                            activation=activation,
                            output_activation=output_activation)
    if squeeze_batch:
        out = out[0]
    if add_beta_bias:
        out = out + 2.0
    if output_squeeze:
        out = jnp.squeeze(out)
    return out


class NeuralNetwork:
    """JAX/Pallas port of the PyTorch NeuralNetwork module.

    layers: list of layer widths, e.g. [obs_dim, hidden, hidden, act_dim].
    activation: "tanh" (hidden activation), output_activation: None or "tanh".
    param_dtype: dtype of the matmul operands (jnp.bfloat16 recommended on
                 v6e/v7x; f32 accumulation / bias / tanh regardless).
    """

    def __init__(self, layers, key, activation="tanh", output_activation=None,
                 output_squeeze=False, add_beta_bias=False,
                 dtype=jnp.float32, param_dtype=None):
        self.activation = activation
        self.output_activation = output_activation
        self.output_squeeze = output_squeeze
        self.add_beta_bias = add_beta_bias
        self.act_dim = layers[-1]
        param_dtype = dtype if param_dtype is None else param_dtype

        self.params = []   # exact f32 params (PyTorch-equivalent), for reference
        weights = []
        biases = []
        # Deterministic init mimicking torch.nn.Linear default:
        #   U(-1/sqrt(fan_in), 1/sqrt(fan_in)) for both weight and bias.
        for i, out_dim in enumerate(layers[1:]):
            in_dim = layers[i]
            key, wk, bk = jax.random.split(key, 3)
            bound = 1.0 / float(in_dim) ** 0.5
            # stored as (in, out) == PyTorch weight.T ; TRUE shapes, no padding
            w = jax.random.uniform(wk, (in_dim, out_dim), dtype,
                                   minval=-bound, maxval=bound)
            b = jax.random.uniform(bk, (1, out_dim), dtype,
                                   minval=-bound, maxval=bound)
            self.params.append((w, b))
            weights.append(w.astype(param_dtype))   # matmul operand dtype
            biases.append(b)                        # bias stays f32
        self.weights = tuple(weights)
        self.biases = tuple(biases)

    def __call__(self, x, *, batch_tile=1024):
        squeeze_batch = (x.ndim == 1)
        if squeeze_batch:
            x = x[None, :]
        tm = _pick_batch_tile(x.shape[0], batch_tile)
        return _mlp_forward(x, self.weights, self.biases,
                            tm=tm,
                            activation=self.activation,
                            output_activation=self.output_activation,
                            add_beta_bias=self.add_beta_bias,
                            output_squeeze=self.output_squeeze,
                            squeeze_batch=squeeze_batch)


if __name__ == "__main__":
    key = jax.random.PRNGKey(0)
    key, pkey, xkey, xkey1, xkeyb = jax.random.split(key, 5)

    # Small shapes consistent with a VPG policy MLP:
    # obs_dim=16, two hidden layers of 32, act_dim=4, batch=2.
    layers = [16, 32, 32, 4]
    batch = 2

    net = NeuralNetwork(layers, pkey, activation="tanh",
                        output_activation=None,
                        output_squeeze=False, add_beta_bias=False)

    def reference(x, params):
        h = x
        for (w, b) in params[:-1]:
            h = jnp.tanh(h @ w + b)
        w, b = params[-1]
        return h @ w + b

    # 1) tiny batch, f32 (exact check)
    x = jax.random.normal(xkey, (batch, layers[0]), jnp.float32)
    out = jax.block_until_ready(net(x))
    ref = reference(x, net.params)
    assert out.shape == (batch, layers[-1]), out.shape
    assert jnp.allclose(out, ref, atol=1e-5, rtol=1e-5), "batch=2 mismatch"

    # 2) single 1-D observation (common VPG call pattern)
    x1 = jax.random.normal(xkey1, (layers[0],), jnp.float32)
    out1 = jax.block_until_ready(net(x1))
    ref1 = reference(x1[None, :], net.params)[0]
    assert out1.shape == (layers[-1],), out1.shape
    assert jnp.allclose(out1, ref1, atol=1e-5, rtol=1e-5), "1-D input mismatch"

    # 3) ragged multi-tile batch (exercises masked last block + >=2 grid steps)
    xb = jax.random.normal(xkeyb, (300, layers[0]), jnp.float32)
    outb = jax.block_until_ready(net(xb))
    refb = reference(xb, net.params)
    assert outb.shape == (300, layers[-1]), outb.shape
    assert jnp.allclose(outb, refb, atol=1e-5, rtol=1e-5), "ragged batch mismatch"

    # 4) bf16 matmul-operand fast path (v6e/v7x), f32 accumulation — loose check
    net_bf16 = NeuralNetwork(layers, pkey, param_dtype=jnp.bfloat16)
    outb16 = jax.block_until_ready(net_bf16(x))
    refb16 = reference(x, net_bf16.params)
    assert outb16.shape == (batch, layers[-1]), outb16.shape
    assert jnp.allclose(outb16, refb16, atol=5e-2, rtol=5e-2), "bf16 path mismatch"

    print("KERNEL_OK")
</pallas_src>

<mosaic_0001>
module attributes {stable_mosaic.version = 11 : i64} {
  func.func @kernel(%arg0: i32, %arg1: memref<2x16xf32, #tpu.memory_space<vmem>>, %arg2: memref<16x32xf32, #tpu.memory_space<vmem>>, %arg3: memref<1x32xf32, #tpu.memory_space<vmem>>, %arg4: memref<32x32xf32, #tpu.memory_space<vmem>>, %arg5: memref<1x32xf32, #tpu.memory_space<vmem>>, %arg6: memref<32x4xf32, #tpu.memory_space<vmem>>, %arg7: memref<1x4xf32, #tpu.memory_space<vmem>>, %arg8: memref<2x4xf32, #tpu.memory_space<vmem>>) attributes {dimension_semantics = [#tpu.dimension_semantics<parallel>], iteration_bounds = array<i64: 1>, scalar_prefetch = 0 : i64, scratch_operands = 0 : i64, tpu.core_type = #tpu.core_type<tc>, window_params = [{transform_indices = @transform_0, window_bounds = array<i64: 2, 16>}, {pipeline_mode = #tpu.pipeline_mode<synchronous>, transform_indices = @transform_1, window_bounds = array<i64: 16, 32>}, {pipeline_mode = #tpu.pipeline_mode<synchronous>, transform_indices = @transform_2, window_bounds = array<i64: 1, 32>}, {pipeline_mode = #tpu.pipeline_mode<synchronous>, transform_indices = @transform_3, window_bounds = array<i64: 32, 32>}, {pipeline_mode = #tpu.pipeline_mode<synchronous>, transform_indices = @transform_4, window_bounds = array<i64: 1, 32>}, {pipeline_mode = #tpu.pipeline_mode<synchronous>, transform_indices = @transform_5, window_bounds = array<i64: 32, 4>}, {pipeline_mode = #tpu.pipeline_mode<synchronous>, transform_indices = @transform_6, window_bounds = array<i64: 1, 4>}, {transform_indices = @transform_7, window_bounds = array<i64: 2, 4>}]} {
    %c0 = arith.constant 0 : index
    %c0_0 = arith.constant 0 : index
    %0 = vector.load %arg1[%c0, %c0_0] : memref<2x16xf32, #tpu.memory_space<vmem>>, vector<2x16xf32>
    %c0_1 = arith.constant 0 : index
    %c0_2 = arith.constant 0 : index
    %1 = vector.load %arg2[%c0_1, %c0_2] : memref<16x32xf32, #tpu.memory_space<vmem>>, vector<16x32xf32>
    %c0_3 = arith.constant 0 : index
    %c0_4 = arith.constant 0 : index
    %2 = vector.load %arg3[%c0_3, %c0_4] : memref<1x32xf32, #tpu.memory_space<vmem>>, vector<1x32xf32>
    %cst = arith.constant dense<0.000000e+00> : vector<2x32xf32>
    %3 = tpu.matmul %0, %1, %cst {dimension_numbers = #tpu.dot_dimension_numbers<[1], [0], [0], [1], [0, 0, 1, 1], [], []>} : vector<2x16xf32>, vector<16x32xf32>, vector<2x32xf32> -> vector<2x32xf32>
    %4 = vector.broadcast %2 : vector<1x32xf32> to vector<2x32xf32>
    %5 = arith.addf %3, %4 : vector<2x32xf32>
    %6 = math.tanh %5 : vector<2x32xf32>
    %c0_5 = arith.constant 0 : index
    %c0_6 = arith.constant 0 : index
    %7 = vector.load %arg4[%c0_5, %c0_6] : memref<32x32xf32, #tpu.memory_space<vmem>>, vector<32x32xf32>
    %c0_7 = arith.constant 0 : index
    %c0_8 = arith.constant 0 : index
    %8 = vector.load %arg5[%c0_7, %c0_8] : memref<1x32xf32, #tpu.memory_space<vmem>>, vector<1x32xf32>
    %cst_9 = arith.constant dense<0.000000e+00> : vector<2x32xf32>
    %9 = tpu.matmul %6, %7, %cst_9 {dimension_numbers = #tpu.dot_dimension_numbers<[1], [0], [0], [1], [0, 0, 1, 1], [], []>} : vector<2x32xf32>, vector<32x32xf32>, vector<2x32xf32> -> vector<2x32xf32>
    %10 = vector.broadcast %8 : vector<1x32xf32> to vector<2x32xf32>
    %11 = arith.addf %9, %10 : vector<2x32xf32>
    %12 = math.tanh %11 : vector<2x32xf32>
    %c0_10 = arith.constant 0 : index
    %c0_11 = arith.constant 0 : index
    %13 = vector.load %arg6[%c0_10, %c0_11] : memref<32x4xf32, #tpu.memory_space<vmem>>, vector<32x4xf32>
    %c0_12 = arith.constant 0 : index
    %c0_13 = arith.constant 0 : index
    %14 = vector.load %arg7[%c0_12, %c0_13] : memref<1x4xf32, #tpu.memory_space<vmem>>, vector<1x4xf32>
    %cst_14 = arith.constant dense<0.000000e+00> : vector<2x4xf32>
    %15 = tpu.matmul %12, %13, %cst_14 {dimension_numbers = #tpu.dot_dimension_numbers<[1], [0], [0], [1], [0, 0, 1, 1], [], []>} : vector<2x32xf32>, vector<32x4xf32>, vector<2x4xf32> -> vector<2x4xf32>
    %16 = vector.broadcast %14 : vector<1x4xf32> to vector<2x4xf32>
    %17 = arith.addf %15, %16 : vector<2x4xf32>
    %c0_15 = arith.constant 0 : index
    %c0_16 = arith.constant 0 : index
    %18 = vector.load %arg8[%c0_15, %c0_16] : memref<2x4xf32, #tpu.memory_space<vmem>>, vector<2x4xf32>
    tpu.vector_store %arg8[%c0_15, %c0_16], %17 {strides = array<i32>} : memref<2x4xf32, #tpu.memory_space<vmem>>, vector<2x4xf32>,
    return
  }
  func.func @transform_0(%arg0: i32) -> (i32, i32) {
    %c0_i32 = arith.constant 0 : i32
    %c0_i32_0 = arith.constant 0 : i32
    return %arg0, %c0_i32 : i32, i32
  }
  func.func @transform_1(%arg0: i32) -> (i32, i32) {
    %c0_i32 = arith.constant 0 : i32
    %c0_i32_0 = arith.constant 0 : i32
    %c0_i32_1 = arith.constant 0 : i32
    return %c0_i32, %c0_i32_0 : i32, i32
  }
  func.func @transform_2(%arg0: i32) -> (i32, i32) {
    %c0_i32 = arith.constant 0 : i32
    %c0_i32_0 = arith.constant 0 : i32
    %c0_i32_1 = arith.constant 0 : i32
    return %c0_i32, %c0_i32_0 : i32, i32
  }
  func.func @transform_3(%arg0: i32) -> (i32, i32) {
    %c0_i32 = arith.constant 0 : i32
    %c0_i32_0 = arith.constant 0 : i32
    %c0_i32_1 = arith.constant 0 : i32
    return %c0_i32, %c0_i32_0 : i32, i32
  }
  func.func @transform_4(%arg0: i32) -> (i32, i32) {
    %c0_i32 = arith.constant 0 : i32
    %c0_i32_0 = arith.constant 0 : i32
    %c0_i32_1 = arith.constant 0 : i32
    return %c0_i32, %c0_i32_0 : i32, i32
  }
  func.func @transform_5(%arg0: i32) -> (i32, i32) {
    %c0_i32 = arith.constant 0 : i32
    %c0_i32_0 = arith.constant 0 : i32
    %c0_i32_1 = arith.constant 0 : i32
    return %c0_i32, %c0_i32_0 : i32, i32
  }
  func.func @transform_6(%arg0: i32) -> (i32, i32) {
    %c0_i32 = arith.constant 0 : i32
    %c0_i32_0 = arith.constant 0 : i32
    %c0_i32_1 = arith.constant 0 : i32
    return %c0_i32, %c0_i32_0 : i32, i32
  }
  func.func @transform_7(%arg0: i32) -> (i32, i32) {
    %c0_i32 = arith.constant 0 : i32
    %c0_i32_0 = arith.constant 0 : i32
    return %arg0, %c0_i32 : i32, i32
  }
}

</mosaic_0001>

<bundles_post_ra>
// kernel: _mlp_forward.1
= control target key start
LH: loop header
LB: loop body
LE: loop exit
PB: predicated region body
PF: predicated region fallthrough
CT: control target
= control target key end

     0   :  { %12 = vsyncpa [#allocation3], 0  ;;  %s544_s0 = inlined_call_operand.vmem [shape: f32[2,16], index: 0, kind: input, shape index: {}]   ;;  %s545_s1 = inlined_call_operand.hbm [shape: f32[16,32], index: 1, kind: input, shape index: {}]   ;;  %s546_s2 = inlined_call_operand.vmem [shape: f32[1,32], index: 2, kind: input, shape index: {}]   ;;  %s547_s3 = inlined_call_operand.vmem [shape: f32[32,32], index: 3, kind: input, shape index: {}]   ;;  %s548_s4 = inlined_call_operand.vmem [shape: f32[1,32], index: 4, kind: input, shape index: {}]   ;;  %s549_s5 = inlined_call_operand.vmem [shape: f32[32,4], index: 5, kind: input, shape index: {}]   ;;  %s550_s6 = inlined_call_operand.vmem [shape: f32[1,4], index: 6, kind: input, shape index: {}]   ;;  %s551_s7 = inlined_call_operand.hbm [shape: f32[2,4], index: 7, kind: output, shape index: {}]  }
   0x1   :  { %13 = vsyncpa [#allocation4], 0  ;;  %s435_s24 = smov [#allocation2]   ;;  %s387_s28 = scalar_lea.hbm %s545_s1, 256 }
   0x2   :  { %s21_s25 = sshll.u32 %s435_s24, 4  ;;  %p388_p0 = scmp.ne.s32.totalorder %s545_s1, %s387_s28  ;;  %s22_s25 = int_to_ptr.vmem [resolvable:$true] %s21_s25 }
   0x3   :  { %p391_p1 = scmp.lt.u32.totalorder %s387_s28, %s545_s1 }
   0x5   :  { %p393_p2 = pnand %p391_p1, %p388_p0 }
   0x7   :  { %396 = shalt.err (!%p393_p2)
}
   0x8   :  { %s397_s10 = scalar_lea.vmem %s22_s25, 256  ;;  %p402_p4 = scmp.lt.s32.totalorder %s22_s25, %s22_s25 }
   0x9   :  { %p398_p3 = scmp.ne.s32.totalorder %s22_s25, %s397_s10  ;;  %p403_p5 = scmp.lt.s32.totalorder %s397_s10, %s397_s10 }
   0xb   :  { %p404_p6 = por %p403_p5, %p402_p4 }
   0xd   :  { %p405_p7 = pnand %p404_p6, %p398_p3 }
   0xf   :  { %408 = shalt.err (!%p405_p7)
}
  0x10   :  { %s436_s11 = smov 128   ;;  %s437_s12 = smov 8  }
  0x11   :  { %27 = dma.hbm_to_vmem [thread:$0]  %s545_s1, 256, %s22_s25, [#allocation3], %s436_s11, %s436_s11, %s437_s12  }
  0x12   :  { %431 = dma.done.wait [#allocation3], 256  }
  0x13   :  { %432 = vsyncadd [#allocation3], 4294967040  ;;  %v438_v0 = vmov 0.0|0.0   ;;  %vm439_vm0 = vmmov 0   ;;  %v440_v1 = vmov 0.0   ;;  %v42_v2 = vld [vmem:[#allocation2] sm:$0xff] }
  0x14   :  { %361 = vmatprep.subr.bf16.mxu0 %v438_v0  ;;  %336 = vmatprep.mubr.msk.f32.mxu0 %vm439_vm0, %v440_v1  ;;  %v43_v3 = vld [vmem:[#allocation2 + $0x8] sm:$0xff]  ;;  %v41_v5 = vld [vmem:[%s544_s0] sm:$0x3]  ;;  %vm51_vm1 = vcmask 130048   ;;  %v128_v8 = vld [vmem:[%s547_s3 + $0x10] sm:$0xff]  ;;  %vm137_vm2 = vcmask 261120  }
  0x15   :  { %364 = vmatprep.subr.bf16.mxu1 %v438_v0  ;;  %347 = vmatprep.mubr.msk.f32.mxu1 %vm439_vm0, %v440_v1  ;;  %v362_v4 = vpack.c.bf16 %v43_v3, %v42_v2  ;;  %v126_v6 = vld [vmem:[%s547_s3] sm:$0xff]  ;;  %v127_v7 = vld [vmem:[%s547_s3 + $0x8] sm:$0xff]  ;;  %v129_v10 = vld [vmem:[%s547_s3 + $0x18] sm:$0xff]  ;;  %vm296_vm3 = vcmask 25600  }
  0x16   :  { %v365_v9 = vpack.c.bf16 %v127_v7, %v126_v6  ;;  %v368_v11 = vpack.c.bf16 %v129_v10, %v128_v8  ;;  %v313_v12 = vld [vmem:[%s546_s2] ss:$0 sm:$0xff]  ;;  %v213_v18 = vld [vmem:[%s549_s5 + $0x8] sm:$0xff]  ;;  %v214_v19 = vld [vmem:[%s549_s5 + $0x10] sm:$0xff] }
  0x17   :  { %363 = vmatpush3.bf16.msra.mxu0 %v362_v4  ;;  %v212_v17 = vld [vmem:[%s549_s5] sm:$0xff]  ;;  %v215_v21 = vld [vmem:[%s549_s5 + $0x18] sm:$0xff]  ;;  %s441_s5 = smov [#allocation5]  }
  0x18   :  { %370 = vmatprep.subr.bf16.mxu0 %v438_v0  ;;  %366 = vmatpush3.bf16.msra.mxu1 %v365_v9  ;;  %v371_v20 = vpack.c.bf16 %v213_v18, %v212_v17  ;;  %v374_v22 = vpack.c.bf16 %v215_v21, %v214_v19  ;;  %v315_v23 = vld [vmem:[%s548_s4] ss:$0 sm:$0xff]  ;;  %s304_s12 = sshll.u32 %s441_s5, 4  ;;  %s305_s12 = int_to_ptr.vmem [resolvable:$true] %s304_s12 }
  0x19   :  { %367 = vmatprep.subr.bf16.mxu1 %v438_v0  ;;  %v317_v28 = vld [vmem:[%s550_s6] ss:$0 sm:$0xff]  ;;  %s409_s4 = scalar_lea.vmem %s305_s12, 32  ;;  %p414_p9 = scmp.lt.s32.totalorder %s305_s12, %s305_s12 }
  0x1a   :  { %337 = vmatmul.mubr.msk.f32.vlgmr.msra.gmra.mrb[0].mxu0 %vm51_vm1, %v41_v5  ;;  %p410_p8 = scmp.ne.s32.totalorder %s305_s12, %s409_s4  ;;  %p415_p10 = scmp.lt.s32.totalorder %s409_s4, %s409_s4 }
  0x1b   :  { %358 = vmatprep.mubr.msk.f32.mxu0 %vm439_vm0, %v440_v1  ;;  %372 = vmatpush3.bf16.msra.mxu0 %v371_v20 }
  0x1c   :  { %369 = vmatpush3.bf16.msra.mxu1 %v368_v11  ;;  %373 = vmatprep.subr.bf16.mxu0 %v438_v0  ;;  %p416_p11 = por %p415_p10, %p414_p9 }
  0x1e   :  { %p417_p12 = pnand %p416_p11, %p410_p8 }
  0x1f   :  { %375 = vmatpush3.bf16.msra.mxu0 %v374_v22 }
  0xed   :  { %v121_v13 = vpop.f32.mrb[0].mxu0 }
  0xee   :  { %v122_v14 = vadd.f32 %v313_v12, %v121_v13  ;;  %v338_v15 = vpop.f32.mrb[1].mxu0 }
  0xf0   :  { %383 = vtanh.f32 %v122_v14 }
  0xfa   :  { %v384_v16 = vpop.eup %383 }
  0xfb   :  { %348 = vmatmul.mubr.msk.f32.vlgmr.msra.gmra.mrb[0].mxu1 %vm137_vm2, %v384_v16 }
 0x1ce   :  { %v207_v24 = vpop.f32.mrb[0].mxu1 }
 0x1cf   :  { %v208_v25 = vadd.f32 %v315_v23, %v207_v24  ;;  %v349_v26 = vpop.f32.mrb[1].mxu1 }
 0x1d1   :  { %385 = vtanh.f32 %v208_v25 }
 0x1db   :  { %v386_v27 = vpop.eup %385 }
 0x1dc   :  { %359 = vmatmul.mubr.msk.f32.vlgmr.msra.gmra.mrb[2].mxu0 %vm137_vm2, %v386_v27 }
 0x2af   :  { %v292_v29 = vpop.f32.mrb[2].mxu0 }
 0x2b0   :  { %v293_v30 = vadd.f32 %v317_v28, %v292_v29  ;;  %v360_v31 = vpop.f32.mrb[3].mxu0 }
 0x2b2   :  { %297 = vst.msk [vmem:[#allocation5] sm:$0x3] %vm296_vm3, %v293_v30 }
 0x2b3   :  { %420 = shalt.err (!%p417_p12)
}
 0x2b4   :  { %s421_s15 = scalar_lea.hbm %s551_s7, 32 }
 0x2b5   :  { %p422_p13 = scmp.ne.s32.totalorder %s551_s7, %s421_s15  ;;  %p425_p0 = scmp.lt.u32.totalorder %s421_s15, %s551_s7 }
 0x2b7   :  { %p427_p1 = pnand %p425_p0, %p422_p13 }
 0x2b9   :  { %430 = shalt.err (!%p427_p1)
}
 0x2ba   :  { %307 = dma.vmem_to_hbm [thread:$0]  %s305_s12, 32, %s551_s7, [#allocation4]  }
 0x2bb   :  { %433 = dma.done.wait [#allocation4], 32  }
 0x2bc   :  { %434 = vsyncadd [#allocation4], 4294967264 }
 0x2bd   :  { %311 = vsyncpa [#allocation3], 1 }
 0x2be   :  { %312 = vsyncpa [#allocation4], 1 }

</bundles_post_ra>
